<compile_context>
chip_gen: v6e
topology: v6e:2x2x1
jax: 0.10.0
libtpu: 0.0.40
codegen_flags: <defaults>
</compile_context>

<pallas_src>
import numpy as np
import jax
import jax.numpy as jnp
from jax import lax
from jax.experimental import pallas as pl
from jax.experimental.pallas import tpu as pltpu

# Sobel taps of the PyTorch module (used only by the pure-JAX reference; the
# kernel uses the separable form G_X = [1,2,1]^T x [-1,0,1],
# G_Y = [1,0,-1]^T x [1,2,1]).
G_X = ((-1.0, 0.0, 1.0), (-2.0, 0.0, 2.0), (-1.0, 0.0, 1.0))
G_Y = ((1.0, 2.0, 1.0), (0.0, 0.0, 0.0), (-1.0, -2.0, -1.0))


def _round_up(x, m):
    return -(-x // m) * m


def _sublane_tile(itemsize):
    return {1: 32, 2: 16, 4: 8}.get(int(itemsize), 8)


def _slab_dims(block_batch, H, W):
    """Tile-aligned scratch-slab dims for `block_batch` lane-packed samples."""
    w_slot = W + 1                                   # W pixels + 1 shared zero gap column
    hs = _round_up(H + 1, 8)                         # >= 1 zero row below the image
    ls = _round_up(block_batch * w_slot, 128)
    return hs, ls


def _roll_m1(x, axis):
    """Roll by -1 expressed as a non-negative static rotation."""
    return pltpu.roll(x, x.shape[axis] - 1, axis)


def _packed_sobel_diff(mask_ref, pred_ref, targ_ref, xp_p, xp_t):
    """|sobel_mag(pred) - sobel_mag(target)| on a lane-packed f32 slab.

    pred_ref / targ_ref : (Bt, C, H, W) VMEM blocks, native dtype.
    xp_p / xp_t         : (Hs, Ls) f32 scratch slabs ((8,128)-tile aligned).
                          The Bt samples sit side by side along the lane axis
                          in slots of width W+1 (one shared zero gap column);
                          only interior cells are ever written — everything
                          else is forced to zero at load time by the mask, so
                          uninitialized / stale VMEM never propagates.
    mask_ref            : (Hs, Ls) f32 constant, 1.0 exactly on interior cells.
    Returns (diff, valid): diff is (Hs, Ls) f32; valid marks real output cells.
    """
    Bt, _, H, W = pred_ref.shape
    w_slot = W + 1

    valid = mask_ref[...] != 0.0

    # One channel-sum reduction for the whole block; cast after native-dtype DMA.
    csum_p = jnp.sum(pred_ref[...].astype(jnp.float32), axis=1)   # (Bt, H, W)
    csum_t = jnp.sum(targ_ref[...].astype(jnp.float32), axis=1)   # (Bt, H, W)

    # Pack samples side by side (sublane-aligned: interior starts at row 0).
    for b in range(Bt):
        lo = b * w_slot
        xp_p[0:H, lo:lo + W] = csum_p[b]
        xp_t[0:H, lo:lo + W] = csum_t[b]

    def mag(slab_ref):
        # Zero halo / stale / padding cells on load (select, not multiply, so
        # NaN bit patterns in never-written VMEM cannot leak through).
        slab = jnp.where(valid, slab_ref[...], 0.0)
        # Separable, multiply-free 3x3 Sobel.  pltpu.roll (XLU) provides the
        # +-1 lane / sublane shifts; wrap-around only ever brings in masked
        # zero cells, and |gx| / |gy| make the result independent of the roll
        # direction convention.
        left = pltpu.roll(slab, 1, 1)
        right = _roll_m1(slab, 1)
        h_s = (left + right) + (slab + slab)          # horizontal [1, 2, 1]
        h_d = right - left                            # horizontal [-1, 0, 1]
        up = pltpu.roll(h_d, 1, 0)
        down = _roll_m1(h_d, 0)
        gx = (up + down) + (h_d + h_d)                # vertical [1, 2, 1] of h_d
        gy = pltpu.roll(h_s, 1, 0) - _roll_m1(h_s, 0)  # vertical [1, 0, -1] of h_s
        return jnp.sqrt(jnp.abs(gx) + jnp.abs(gy) + 1e-10)

    return jnp.abs(mag(xp_p) - mag(xp_t)), valid


def _sobel_sum_kernel(mask_ref, pred_ref, targ_ref, sum_ref, xp_p, xp_t):
    """'mean'/'sum' path: emit only a tiny per-grid-step partial sum."""
    diff, valid = _packed_sobel_diff(mask_ref, pred_ref, targ_ref, xp_p, xp_t)
    masked = jnp.where(valid, diff, 0.0)
    part = jnp.sum(masked, axis=1, keepdims=True)        # (Hs, 1)
    sum_ref[0] = jnp.sum(part, axis=0, keepdims=True)    # (1, 1)


def _sobel_map_kernel(mask_ref, pred_ref, targ_ref, map_ref, xp_p, xp_t):
    """'none' path: one lane-dense (Hs, Ls) store; wrapper unpacks with XLA."""
    diff, _ = _packed_sobel_diff(mask_ref, pred_ref, targ_ref, xp_p, xp_t)
    map_ref[0] = diff


def _block_vmem_bytes(block_batch, C, H, W, itemsize, none_out):
    """Hardware-padded VMEM footprint of one grid step."""
    hs, ls = _slab_dims(block_batch, H, W)
    sub = _sublane_tile(itemsize)
    in_blk = block_batch * C * _round_up(H, sub) * _round_up(W, 128) * itemsize
    slab = hs * ls * 4
    temps = 8 * slab            # h_s, h_d, gx, gy, mag_p, mag_t, diff, masked
    out_blk = slab if none_out else 8 * 128 * 4
    return (2 * 2 * in_blk       # two inputs, double-buffered
            + 2 * slab           # mask input, double-buffered
            + 2 * slab           # two scratch slabs
            + temps
            + 2 * out_blk        # output block, double-buffered
            + (1 << 14))


def _choose_block_batch(N, C, H, W, itemsize, budget, none_out):
    """Samples packed per grid step: target ~512 lanes, fit the VMEM budget,
    prefer low 128-lane padding, keep >= 2 grid steps, and divide N exactly."""
    w_slot = W + 1
    lane_target = max(1, 512 // w_slot)
    bt_cap = 1
    for bt in range(2, min(N, 1024) + 1):
        if _block_vmem_bytes(bt, C, H, W, itemsize, none_out) <= budget:
            bt_cap = bt
        else:
            break
    target = max(1, min(N, lane_target, bt_cap))
    if N >= 2:  # >= 2 grid steps so the 'parallel' axis feeds both v7x cores
        target = max(1, min(target, N // 2))
    # TODO(synk): relax the divides-N constraint by masking a ragged tail block.
    best, best_score = 1, -1.0
    for d in range(1, target + 1):
        if N % d:
            continue
        lanes = d * w_slot
        score = d * (lanes / _round_up(lanes, 128))   # reward lanes, punish pad
        if score > best_score:
            best, best_score = d, score
    return best


def sobel_loss_pallas(pred, target, loss_weight=1.0, reduction='mean', weight=None):
    del weight  # accepted by the torch module's forward() but never used
    if reduction not in ('none', 'mean', 'sum'):
        raise ValueError(f"Unsupported reduction mode: {reduction}")
    N, C, H, W = pred.shape
    assert target.shape == pred.shape, (pred.shape, target.shape)

    itemsize = max(np.dtype(pred.dtype).itemsize, np.dtype(target.dtype).itemsize)
    none_out = reduction == 'none'

    # Physical-VMEM-aware budget: ~48 MiB cap on v7x (64 MiB/TC), ~96 MiB on
    # v5e/v6e (128 MiB), always leaving headroom for compiler scratch.
    try:
        phys_vmem = int(pltpu.get_tpu_info().vmem_capacity_bytes)
    except Exception:
        phys_vmem = 64 << 20
    vmem_cap = max(24 << 20, min(phys_vmem - (16 << 20), 96 << 20))

    Bt = _choose_block_batch(N, C, H, W, itemsize, (vmem_cap * 2) // 3, none_out)
    G = N // Bt
    w_slot = W + 1
    Hs, Ls = _slab_dims(Bt, H, W)
    Lp = Bt * w_slot

    # Interior mask (built once on host): 1.0 exactly on cells that hold a real
    # (sample, row, col) pixel; 0.0 on gap columns and padding rows / columns.
    mask_np = np.zeros((Hs, Ls), np.float32)
    for b in range(Bt):
        mask_np[0:H, b * w_slot:b * w_slot + W] = 1.0
    mask = jnp.asarray(mask_np)

    mask_spec = pl.BlockSpec((Hs, Ls), lambda g: (0, 0))
    in_spec = pl.BlockSpec((Bt, C, H, W), lambda g: (g, 0, 0, 0))
    scratch = [pltpu.VMEM((Hs, Ls), jnp.float32),
               pltpu.VMEM((Hs, Ls), jnp.float32)]

    est = _block_vmem_bytes(Bt, C, H, W, itemsize, none_out)
    cp = pltpu.CompilerParams(
        dimension_semantics=("parallel",),
        vmem_limit_bytes=int(min(vmem_cap, max(32 << 20, 2 * est))))

    # TODO(synk): for very large images add an H-strip grid axis (128-256 rows,
    # 2-row halo) via an overlapping Element index_map or pl.ANY + manual
    # make_async_copy so whole samples need not fit in VMEM.
    # TODO(synk): for W << 128 a lane-dense (N, C, H*W) input layout would make
    # the channel-sum pass full-lane; skipped to avoid an in-kernel relayout.

    if reduction in ('mean', 'sum'):
        # No (N, H, W) diff-map writeback — only G tiny partial sums.
        partial = pl.pallas_call(
            _sobel_sum_kernel,
            out_shape=jax.ShapeDtypeStruct((G, 1, 1), jnp.float32),
            grid_spec=pltpu.PrefetchScalarGridSpec(
                num_scalar_prefetch=0,
                grid=(G,),
                in_specs=[mask_spec, in_spec, in_spec],
                out_specs=pl.BlockSpec((1, 1, 1), lambda g: (g, 0, 0)),
                scratch_shapes=scratch),
            compiler_params=cp,
        )(mask, pred, target)
        total = jnp.sum(partial)
        # torch output has shape (N, N, H, W) with N identical channels.
        loss = total / (N * H * W) if reduction == 'mean' else total * N
        return loss_weight * loss

    # reduction == 'none': lane-dense packed output, unpacked with cheap XLA.
    packed = pl.pallas_call(
        _sobel_map_kernel,
        out_shape=jax.ShapeDtypeStruct((G, Hs, Ls), jnp.float32),
        grid_spec=pltpu.PrefetchScalarGridSpec(
            num_scalar_prefetch=0,
            grid=(G,),
            in_specs=[mask_spec, in_spec, in_spec],
            out_specs=pl.BlockSpec((1, Hs, Ls), lambda g: (g, 0, 0)),
            scratch_shapes=scratch),
        compiler_params=cp,
    )(mask, pred, target)
    maps = packed[:, 0:H, 0:Lp].reshape(G, H, Bt, w_slot)[..., 0:W]
    maps = jnp.transpose(maps, (0, 2, 1, 3)).reshape(N, H, W)
    # NOTE: torch returns (N, N, H, W) with N identical channels; we return the
    # per-sample map and leave the (lazy) broadcast to callers that need it.
    return loss_weight * maps


def sobel_loss_ref(pred, target, reduction='mean'):
    """Pure-JAX reference that mirrors the torch code literally."""
    N, C, H, W = pred.shape
    kx = jnp.broadcast_to(jnp.asarray(G_X, jnp.float32), (N, C, 3, 3))
    ky = jnp.broadcast_to(jnp.asarray(G_Y, jnp.float32), (N, C, 3, 3))
    dn = ('NCHW', 'OIHW', 'NCHW')

    def conv(x, k):
        return lax.conv_general_dilated(
            x.astype(jnp.float32), k, (1, 1), ((1, 1), (1, 1)),
            dimension_numbers=dn, precision=lax.Precision.HIGHEST)

    ti = jnp.sqrt(jnp.abs(conv(pred, kx)) + jnp.abs(conv(pred, ky)) + 1e-10)
    gi = jnp.sqrt(jnp.abs(conv(target, kx)) + jnp.abs(conv(target, ky)) + 1e-10)
    d = jnp.abs(ti - gi)
    if reduction == 'mean':
        return jnp.mean(d)
    if reduction == 'sum':
        return jnp.sum(d)
    return d


if __name__ == "__main__":
    key = jax.random.PRNGKey(0)
    loss_weight = 1.0
    configs = [(2, 4, 16, 16), (4, 3, 8, 8)]   # second config exercises Bt > 1
    for (N, C, H, W) in configs:
        key, k1, k2 = jax.random.split(key, 3)
        pred = jax.random.normal(k1, (N, C, H, W), jnp.float32)
        target = jax.random.normal(k2, (N, C, H, W), jnp.float32)

        # default module behavior: reduction='mean'
        out_mean = jax.block_until_ready(
            sobel_loss_pallas(pred, target, loss_weight, 'mean'))
        ref_mean = loss_weight * sobel_loss_ref(pred, target, 'mean')
        np.testing.assert_allclose(np.asarray(out_mean), np.asarray(ref_mean),
                                   rtol=1e-5, atol=1e-5)

        out_sum = jax.block_until_ready(
            sobel_loss_pallas(pred, target, loss_weight, 'sum'))
        ref_sum = loss_weight * sobel_loss_ref(pred, target, 'sum')
        np.testing.assert_allclose(np.asarray(out_sum), np.asarray(ref_sum),
                                   rtol=1e-5, atol=1e-5)

        out_none = jax.block_until_ready(
            sobel_loss_pallas(pred, target, loss_weight, 'none'))
        # torch 'none' output is (N, N, H, W) with N identical channels; the
        # kernel returns the per-sample (N, H, W) map — compare to channel 0.
        ref_none = loss_weight * sobel_loss_ref(pred, target, 'none')[:, 0]
        np.testing.assert_allclose(np.asarray(out_none), np.asarray(ref_none),
                                   rtol=1e-5, atol=1e-5)

    print("KERNEL_OK")
</pallas_src>

<mosaic_0001>
module attributes {stable_mosaic.version = 11 : i64} {
  func.func @_sobel_sum_kernel(%arg0: i32, %arg1: memref<24x128xf32, #tpu.memory_space<vmem>>, %arg2: memref<1x4x16x16xf32, #tpu.memory_space<vmem>>, %arg3: memref<1x4x16x16xf32, #tpu.memory_space<vmem>>, %arg4: memref<1x1x1xf32, #tpu.memory_space<vmem>>, %arg5: memref<24x128xf32, #tpu.memory_space<vmem>>, %arg6: memref<24x128xf32, #tpu.memory_space<vmem>>) attributes {dimension_semantics = [#tpu.dimension_semantics<parallel>], iteration_bounds = array<i64: 2>, scalar_prefetch = 0 : i64, scratch_operands = 2 : i64, tpu.core_type = #tpu.core_type<tc>, window_params = [{pipeline_mode = #tpu.pipeline_mode<synchronous>, transform_indices = @transform_0, window_bounds = array<i64: 24, 128>}, {transform_indices = @transform_1, window_bounds = array<i64: 1, 4, 16, 16>}, {transform_indices = @transform_2, window_bounds = array<i64: 1, 4, 16, 16>}, {transform_indices = @transform_3, window_bounds = array<i64: 1, 1, 1>}]} {
    %c0 = arith.constant 0 : index
    %c0_0 = arith.constant 0 : index
    %0 = vector.load %arg1[%c0, %c0_0] : memref<24x128xf32, #tpu.memory_space<vmem>>, vector<24x128xf32>
    %cst = arith.constant 0.000000e+00 : f32
    %1 = vector.broadcast %cst : f32 to vector<24x128xf32>
    %2 = arith.cmpf one, %0, %1 : vector<24x128xf32>
    %c0_1 = arith.constant 0 : index
    %c0_2 = arith.constant 0 : index
    %c0_3 = arith.constant 0 : index
    %c0_4 = arith.constant 0 : index
    %3 = vector.load %arg2[%c0_1, %c0_2, %c0_3, %c0_4] : memref<1x4x16x16xf32, #tpu.memory_space<vmem>>, vector<1x4x16x16xf32>
    %cst_5 = arith.constant dense<0.000000e+00> : vector<1x16x16xf32>
    %4 = vector.multi_reduction <add>, %3, %cst_5 [1] : vector<1x4x16x16xf32> to vector<1x16x16xf32>
    %c0_6 = arith.constant 0 : index
    %c0_7 = arith.constant 0 : index
    %c0_8 = arith.constant 0 : index
    %c0_9 = arith.constant 0 : index
    %5 = vector.load %arg3[%c0_6, %c0_7, %c0_8, %c0_9] : memref<1x4x16x16xf32, #tpu.memory_space<vmem>>, vector<1x4x16x16xf32>
    %cst_10 = arith.constant dense<0.000000e+00> : vector<1x16x16xf32>
    %6 = vector.multi_reduction <add>, %5, %cst_10 [1] : vector<1x4x16x16xf32> to vector<1x16x16xf32>
    %7 = vector.shape_cast %4 : vector<1x16x16xf32> to vector<16x16xf32>
    %c0_11 = arith.constant 0 : index
    %c0_12 = arith.constant 0 : index
    %8 = vector.load %arg5[%c0_11, %c0_12] : memref<24x128xf32, #tpu.memory_space<vmem>>, vector<16x16xf32>
    tpu.vector_store %arg5[%c0_11, %c0_12], %7 {strides = array<i32>} : memref<24x128xf32, #tpu.memory_space<vmem>>, vector<16x16xf32>,
    %9 = vector.shape_cast %6 : vector<1x16x16xf32> to vector<16x16xf32>
    %c0_13 = arith.constant 0 : index
    %c0_14 = arith.constant 0 : index
    %10 = vector.load %arg6[%c0_13, %c0_14] : memref<24x128xf32, #tpu.memory_space<vmem>>, vector<16x16xf32>
    tpu.vector_store %arg6[%c0_13, %c0_14], %9 {strides = array<i32>} : memref<24x128xf32, #tpu.memory_space<vmem>>, vector<16x16xf32>,
    %c0_15 = arith.constant 0 : index
    %c0_16 = arith.constant 0 : index
    %11 = vector.load %arg5[%c0_15, %c0_16] : memref<24x128xf32, #tpu.memory_space<vmem>>, vector<24x128xf32>
    %cst_17 = arith.constant 0.000000e+00 : f32
    %12 = vector.broadcast %cst_17 : f32 to vector<24x128xf32>
    %13 = arith.select %2, %11, %12 : vector<24x128xi1>, vector<24x128xf32>
    %c1_i32 = arith.constant 1 : i32
    %14 = tpu.dynamic_rotate %13 by %c1_i32 dim 1 : vector<24x128xf32>, i32 -> vector<24x128xf32>
    %c127_i32 = arith.constant 127 : i32
    %15 = tpu.dynamic_rotate %13 by %c127_i32 dim 1 : vector<24x128xf32>, i32 -> vector<24x128xf32>
    %16 = arith.addf %14, %15 : vector<24x128xf32>
    %17 = arith.addf %13, %13 : vector<24x128xf32>
    %18 = arith.addf %16, %17 : vector<24x128xf32>
    %19 = arith.subf %15, %14 : vector<24x128xf32>
    %c1_i32_18 = arith.constant 1 : i32
    %20 = tpu.dynamic_rotate %19 by %c1_i32_18 dim 0 : vector<24x128xf32>, i32 -> vector<24x128xf32>
    %c23_i32 = arith.constant 23 : i32
    %21 = tpu.dynamic_rotate %19 by %c23_i32 dim 0 : vector<24x128xf32>, i32 -> vector<24x128xf32>
    %22 = arith.addf %20, %21 : vector<24x128xf32>
    %23 = arith.addf %19, %19 : vector<24x128xf32>
    %24 = arith.addf %22, %23 : vector<24x128xf32>
    %c1_i32_19 = arith.constant 1 : i32
    %25 = tpu.dynamic_rotate %18 by %c1_i32_19 dim 0 : vector<24x128xf32>, i32 -> vector<24x128xf32>
    %c23_i32_20 = arith.constant 23 : i32
    %26 = tpu.dynamic_rotate %18 by %c23_i32_20 dim 0 : vector<24x128xf32>, i32 -> vector<24x128xf32>
    %27 = arith.subf %25, %26 : vector<24x128xf32>
    %28 = math.absf %24 : vector<24x128xf32>
    %29 = math.absf %27 : vector<24x128xf32>
    %30 = arith.addf %28, %29 : vector<24x128xf32>
    %cst_21 = arith.constant 1.000000e-10 : f32
    %31 = vector.broadcast %cst_21 : f32 to vector<24x128xf32>
    %32 = arith.addf %30, %31 : vector<24x128xf32>
    %33 = math.sqrt %32 : vector<24x128xf32>
    %c0_22 = arith.constant 0 : index
    %c0_23 = arith.constant 0 : index
    %34 = vector.load %arg6[%c0_22, %c0_23] : memref<24x128xf32, #tpu.memory_space<vmem>>, vector<24x128xf32>
    %cst_24 = arith.constant 0.000000e+00 : f32
    %35 = vector.broadcast %cst_24 : f32 to vector<24x128xf32>
    %36 = arith.select %2, %34, %35 : vector<24x128xi1>, vector<24x128xf32>
    %c1_i32_25 = arith.constant 1 : i32
    %37 = tpu.dynamic_rotate %36 by %c1_i32_25 dim 1 : vector<24x128xf32>, i32 -> vector<24x128xf32>
    %c127_i32_26 = arith.constant 127 : i32
    %38 = tpu.dynamic_rotate %36 by %c127_i32_26 dim 1 : vector<24x128xf32>, i32 -> vector<24x128xf32>
    %39 = arith.addf %37, %38 : vector<24x128xf32>
    %40 = arith.addf %36, %36 : vector<24x128xf32>
    %41 = arith.addf %39, %40 : vector<24x128xf32>
    %42 = arith.subf %38, %37 : vector<24x128xf32>
    %c1_i32_27 = arith.constant 1 : i32
    %43 = tpu.dynamic_rotate %42 by %c1_i32_27 dim 0 : vector<24x128xf32>, i32 -> vector<24x128xf32>
    %c23_i32_28 = arith.constant 23 : i32
    %44 = tpu.dynamic_rotate %42 by %c23_i32_28 dim 0 : vector<24x128xf32>, i32 -> vector<24x128xf32>
    %45 = arith.addf %43, %44 : vector<24x128xf32>
    %46 = arith.addf %42, %42 : vector<24x128xf32>
    %47 = arith.addf %45, %46 : vector<24x128xf32>
    %c1_i32_29 = arith.constant 1 : i32
    %48 = tpu.dynamic_rotate %41 by %c1_i32_29 dim 0 : vector<24x128xf32>, i32 -> vector<24x128xf32>
    %c23_i32_30 = arith.constant 23 : i32
    %49 = tpu.dynamic_rotate %41 by %c23_i32_30 dim 0 : vector<24x128xf32>, i32 -> vector<24x128xf32>
    %50 = arith.subf %48, %49 : vector<24x128xf32>
    %51 = math.absf %47 : vector<24x128xf32>
    %52 = math.absf %50 : vector<24x128xf32>
    %53 = arith.addf %51, %52 : vector<24x128xf32>
    %cst_31 = arith.constant 1.000000e-10 : f32
    %54 = vector.broadcast %cst_31 : f32 to vector<24x128xf32>
    %55 = arith.addf %53, %54 : vector<24x128xf32>
    %56 = math.sqrt %55 : vector<24x128xf32>
    %57 = arith.subf %33, %56 : vector<24x128xf32>
    %58 = math.absf %57 : vector<24x128xf32>
    %cst_32 = arith.constant 0.000000e+00 : f32
    %59 = vector.broadcast %cst_32 : f32 to vector<24x128xf32>
    %60 = arith.select %2, %58, %59 : vector<24x128xi1>, vector<24x128xf32>
    %cst_33 = arith.constant dense<0.000000e+00> : vector<24xf32>
    %61 = vector.multi_reduction <add>, %60, %cst_33 [1] : vector<24x128xf32> to vector<24xf32>
    %62 = vector.shape_cast %61 : vector<24xf32> to vector<24x1xf32>
    %cst_34 = arith.constant dense<0.000000e+00> : vector<1xf32>
    %63 = vector.multi_reduction <add>, %62, %cst_34 [0] : vector<24x1xf32> to vector<1xf32>
    %64 = vector.shape_cast %63 : vector<1xf32> to vector<1x1xf32>
    %c0_35 = arith.constant 0 : index
    %c0_36 = arith.constant 0 : index
    %c0_37 = arith.constant 0 : index
    %65 = vector.load %arg4[%c0_35, %c0_36, %c0_37] : memref<1x1x1xf32, #tpu.memory_space<vmem>>, vector<1x1x1xf32>
    %66 = vector.shape_cast %65 : vector<1x1x1xf32> to vector<1x1xf32>
    %67 = vector.shape_cast %64 : vector<1x1xf32> to vector<1x1x1xf32>
    tpu.vector_store %arg4[%c0_35, %c0_36, %c0_37], %67 {strides = array<i32>} : memref<1x1x1xf32, #tpu.memory_space<vmem>>, vector<1x1x1xf32>,
    return
  }
  func.func @transform_0(%arg0: i32) -> (i32, i32) {
    %c0_i32 = arith.constant 0 : i32
    %c0_i32_0 = arith.constant 0 : i32
    %c0_i32_1 = arith.constant 0 : i32
    return %c0_i32, %c0_i32_0 : i32, i32
  }
  func.func @transform_1(%arg0: i32) -> (i32, i32, i32, i32) {
    %c0_i32 = arith.constant 0 : i32
    %c0_i32_0 = arith.constant 0 : i32
    %c0_i32_1 = arith.constant 0 : i32
    %c0_i32_2 = arith.constant 0 : i32
    return %arg0, %c0_i32, %c0_i32_0, %c0_i32_1 : i32, i32, i32, i32
  }
  func.func @transform_2(%arg0: i32) -> (i32, i32, i32, i32) {
    %c0_i32 = arith.constant 0 : i32
    %c0_i32_0 = arith.constant 0 : i32
    %c0_i32_1 = arith.constant 0 : i32
    %c0_i32_2 = arith.constant 0 : i32
    return %arg0, %c0_i32, %c0_i32_0, %c0_i32_1 : i32, i32, i32, i32
  }
  func.func @transform_3(%arg0: i32) -> (i32, i32, i32) {
    %c0_i32 = arith.constant 0 : i32
    %c0_i32_0 = arith.constant 0 : i32
    %c0_i32_1 = arith.constant 0 : i32
    return %arg0, %c0_i32, %c0_i32_0 : i32, i32, i32
  }
}

</mosaic_0001>

<bundles_post_ra>
// kernel: tpu_custom_call.1
= control target key start
LH: loop header
LB: loop body
LE: loop exit
PB: predicated region body
PF: predicated region fallthrough
CT: control target
= control target key end

     0   :  { %8 = vsyncpa [#allocation5], 0  ;;  %s1212_s0 = inlined_call_operand.hbm [shape: f32[24,128], index: 0, kind: input, shape index: {}]   ;;  %s1213_s1 = inlined_call_operand.hbm [shape: f32[2,4,16,16], index: 1, kind: input, shape index: {}]   ;;  %s1214_s2 = inlined_call_operand.hbm [shape: f32[2,4,16,16], index: 2, kind: input, shape index: {}]   ;;  %s1215_s3 = inlined_call_operand.vmem [shape: f32[2,1,1], index: 3, kind: output, shape index: {}]  }
   0x1   :  { %9 = vsyncpa [#allocation7], 0 }
   0x2   :  { %11 = vsyncpa [#allocation7 + $0x1], 0  ;;  %s850_s12 = smov 0   ;;  %s852_s13 = smov 0  }
   0x3   :  { %s854_s14 = smov 0   ;;  %s856_s15 = smov 0  }
   0x4 LB: > { %s871_s16 = sadd.s32 1, %s821_s15   ;;  %s45_s17 = sadd.s32 1, %s817_s14  ;;  %s821_s15 = sphi %s856_s15, %s1229_s15   ;;  %s817_s14 = sphi %s854_s14, %s1228_s14   ;;  %s813_s13 = sphi %s852_s13, %s1227_s13   ;;  %s809_s12 = sphi %s850_s12, %s1226_s12  }
   0x5   : > { %s42_s18 = ssub.s32 %s821_s15, %s871_s16  ;;  %p52_p0 = scmp.ne.s32.totalorder %s817_s14, %s813_s13 }
   0x6   : > { %p43_p1 = scmp.eq.s32.totalorder %s42_s18, 0  ;;  %p53_p2 = scmp.eq.s32.totalorder %s821_s15, 0 }
   0x7   : > { %p650_p4 = scmp.lt.s32.totalorder %s821_s15, 2  ;;  %s147_s20 = sand.u32 1, %s821_s15  }
   0x8   : > { %s880_s19 = scalar_select %p43_p1, %s817_s14, %s45_s17  }
   0x9   : > { %p54_p3 = por %p53_p2, %p52_p0  ;;  %s149_s21 = sand.u32 1, %s817_s14  }
   0xa   : > { %s885_s22 = sshll.u32 %s149_s21, 6  ;;  %s628_s23 = sshll.u32 %s821_s15, 10 }
   0xb   : > { %s893_s26 = scalar_lea.hbm %s1213_s1, %s628_s23  ;;  %s151_s27 = scalar_lea.vmem [#allocation6], %s885_s22 }
   0xc   : > { %s158_s28 = sshll.u32 %s151_s27, 4  ;;  %p896_p5 = pnand %p650_p4, %p54_p3  ;;  %s900_s28 = int_to_ptr.vmem [resolvable:$true] %s158_s28 }
   0xd   : > { %s902_s30 = scalar_lea.sflag [#allocation7], %s147_s20  ;;  %s701_s4 = scalar_lea.hbm %s893_s26, 1024 }
   0xe   : > { %p702_p6 = scmp.ne.s32.totalorder %s893_s26, %s701_s4  ;;  %p703_p7 = pneg %p896_p5 }
   0xf   : > { %s706_s7 = scalar_lea.hbm %s1213_s1, 2048  ;;  %p707_p10 = scmp.lt.s32.totalorder %s893_s26, %s1213_s1 }
  0x10   : > { %p704_p8 = pnand %p703_p7, %p702_p6  ;;  %p708_p11 = scmp.lt.s32.totalorder %s706_s7, %s701_s4 }
  0x12   : > { %p705_p9 = pneg %p704_p8  ;;  %p709_p12 = por %p708_p11, %p707_p10 }
  0x14   : > { %p710_p13 = pnand %p709_p12, %p705_p9 }
  0x16   : > { %713 = shalt.err (!%p710_p13)
}
  0x17   : > { %s714_s10 = scalar_lea.vmem %s900_s28, 1024  ;;  %s823_s11 = smov [#allocation6]  }
  0x18   : > { %p715_p0 = scmp.ne.s32.totalorder %s900_s28, %s714_s10  ;;  %s719_s17 = sshll.u32 %s823_s11, 4  ;;  %s720_s17 = int_to_ptr.vmem [resolvable:$false] %s719_s17 }
  0x19   : > { %s721_s18 = scalar_lea.vmem %s720_s17, 2048  ;;  %p722_p3 = scmp.lt.s32.totalorder %s900_s28, %s720_s17 }
  0x1a   : > { %p717_p1 = pnand %p715_p0, %p703_p7  ;;  %p723_p4 = scmp.lt.s32.totalorder %s721_s18, %s714_s10 }
  0x1c   : > { %p718_p2 = pneg %p717_p1  ;;  %p724_p6 = por %p723_p4, %p722_p3 }
  0x1e   : > { %p725_p8 = pnand %p724_p6, %p718_p2 }
  0x20   : > { %728 = shalt.err (!%p725_p8)
}
  0x21   : > { %s824_s20 = smov 128   ;;  %s825_s21 = smov 8  }
  0x22   : > { %645 = dma.hbm_to_vmem [thread:$0]  (!%p896_p5), %s893_s26, 1024, %s900_s28, %s902_s30, %s824_s20, %s824_s20, %s825_s21  }
  0x23   : > { %s937_s27 = scalar_lea.hbm %s1214_s2, %s628_s23  ;;  %s172_s4 = scalar_lea.vmem [#allocation8], %s885_s22 }
  0x24   : > { %s179_s5 = sshll.u32 %s172_s4, 4  ;;  %s941_s6 = sadd.s32 4294967295, %s821_s15   ;;  %s954_s5 = int_to_ptr.vmem [resolvable:$true] %s179_s5 }
  0x25   : > { %p58_p9 = scmp.ne.s32.totalorder %s813_s13, %s809_s12  ;;  %p1216_p10 = scmp.eq.s32.totalorder %s941_s6, 0 }
  0x26   : > { %p613_p11 = scmp.ge.s32.totalorder %s821_s15, 1  ;;  %p121_p12 = scmp.lt.s32.totalorder %s821_s15, 3 }
  0x27   : > { %p950_p13 = por %p1216_p10, %p58_p9  ;;  %s826_s22 = smov [#allocation4]  }
  0x28   : > { %p956_p0 = pnand %p613_p11, %p121_p12  ;;  %s960_s28 = sshll.u32 %s826_s22, 4  ;;  %s134_s28 = int_to_ptr.vmem [resolvable:$true] %s960_s28 }
  0x29   : > { %s1219_s26 = scalar_select %p950_p13, 1, 0 }
  0x2a   : > { %s729_s12 = scalar_lea.hbm %s937_s27, 1024  ;;  %s734_s8 = scalar_lea.hbm %s1214_s2, 2048 }
  0x2b   : > { %p730_p2 = scmp.ne.s32.totalorder %s937_s27, %s729_s12  ;;  %p735_p6 = scmp.lt.s32.totalorder %s937_s27, %s1214_s2 }
  0x2c   : > { %p736_p8 = scmp.lt.s32.totalorder %s734_s8, %s729_s12 }
  0x2d   : > { %p732_p3 = pnand %p730_p2, %p703_p7 }
  0x2e   : > { %p737_p9 = por %p736_p8, %p735_p6 }
  0x2f   : > { %p733_p4 = pneg %p732_p3 }
  0x31   : > { %p738_p11 = pnand %p737_p9, %p733_p4 }
  0x33   : > { %741 = shalt.err (!%p738_p11)
}
  0x34   : > { %s742_s11 = scalar_lea.vmem %s954_s5, 1024  ;;  %s827_s17 = smov [#allocation8]  }
  0x35   : > { %p743_p12 = scmp.ne.s32.totalorder %s954_s5, %s742_s11  ;;  %s747_s18 = sshll.u32 %s827_s17, 4  ;;  %s748_s18 = int_to_ptr.vmem [resolvable:$false] %s747_s18 }
  0x36   : > { %s749_s24 = scalar_lea.vmem %s748_s18, 2048  ;;  %p750_p1 = scmp.lt.s32.totalorder %s954_s5, %s748_s18 }
  0x37   : > { %p745_p2 = pnand %p743_p12, %p703_p7  ;;  %p751_p10 = scmp.lt.s32.totalorder %s749_s24, %s742_s11 }
  0x39   : > { %p746_p3 = pneg %p745_p2  ;;  %p752_p13 = por %p751_p10, %p750_p1 }
  0x3b   : > { %p753_p6 = pnand %p752_p13, %p746_p3 }
  0x3d   : > { %756 = shalt.err (!%p753_p6)
}
  0x3e   : > { %648 = dma.hbm_to_vmem [thread:$0]  (!%p896_p5), %s937_s27, 1024, %s954_s5, %s902_s30, %s824_s20, %s824_s20, %s825_s21  }
  0x3f   : > { %p1221_p7 = scmp.eq.s32.totalorder %s941_s6, 0  ;;  %p1222_p4 = pneg %p956_p0 }
  0x40   : > { %s768_s25 = scalar_lea.vmem %s134_s28, 384  ;;  %p776_p11 = scmp.lt.s32.totalorder %s134_s28, %s134_s28 }
  0x41   : > { %p639_p8 = pnand %p1222_p4, %p1221_p7  ;;  %p769_p13 = scmp.ne.s32.totalorder %s134_s28, %s768_s25 }
  0x42   : > { %p777_p12 = scmp.lt.s32.totalorder %s768_s25, %s768_s25 }
  0x43   : > { %p759_p10 = pneg %p639_p8 }
  0x44   : > { %p778_p2 = por %p777_p12, %p776_p11 }
  0x45   : > { %p771_p1 = pnand %p769_p13, %p759_p10 }
  0x47   : > { %p772_p9 = pneg %p771_p1 }
  0x49   : > { %p779_p3 = pnand %p778_p2, %p772_p9 }
  0x4b   : > { %782 = shalt.err (!%p779_p3)
}
  0x4c   : > { %641 = dma.hbm_to_vmem [thread:$0]  (!%p639_p8), %s1212_s0, 384, %s134_s28, [#allocation5], %s824_s20, %s824_s20, %s825_s21  }
  0x4d   : > { %191 = sbr.rel (%p956_p0) target bundleno = 441 (0x1b9), region = 32  ;;  %p1223_p5 = scmp.eq.s32.totalorder (!%p956_p0), %s941_s6, 0 }
  0x52   : > { %800 = dma.done.wait (%p1223_p5), [#allocation5], 384   ;;  %p1224_p6 = pmov %p1223_p5 }
  0x53   : > { %s197_s27 = sand.u32 1, %s941_s6   ;;  %s199_s4 = sand.u32 1, %s813_s13  }
  0x54   : > { %802 = vsyncadd (%p1224_p6), [#allocation5], 4294966912  ;;  %s624_s5 = sshll.u32 %s199_s4, 6  ;;  %s198_s22 = scalar_lea.sflag [#allocation7], %s197_s27 }
  0x55   : > { %s1010_s12 = scalar_lea.vmem [#allocation6], %s624_s5  ;;  %p1225_p7 = scmp.ne.s32.totalorder %s1219_s26, 0 }
  0x57   : > { %804 = dma.done.wait (%p1225_p7), %s198_s22, 2048  }
  0x58   : > { %806 = vsyncadd (%p1225_p7), %s198_s22, 4294965248  ;;  %vm253_vm0 = vcmask 130048   ;;  %v1016_v0 = vld [vmem:[#allocation4 + $0x10] sm:$0xff]  ;;  %v296_v1 = vld [vmem:[#allocation2 + $0x10] sm:$0xff]  ;;  %s828_s20 = smov 1   ;;  %s210_s21 = scalar_lea.vmem [#allocation8], %s624_s5 }
  0x59   : > { %v399_v2 = vld [vmem:[#allocation3 + $0x10] sm:$0xff]  ;;  %vm244_vm1 = vcmp.ne.f32.partialorder %v1016_v0, 0.0  ;;  %v247_v4 = vld [vmem:[%s1010_s12 + $0x10] sm:$0xff]  ;;  %v269_v12 = vld [vmem:[%s210_s21 + $0x8] sm:$0xff]  ;;  %s829_s26 = smov 127   ;;  %p236_p0 = scmp.lt.s32.totalorder %s941_s6, 1 }
  0x5a   : > { %v245_v3 = vld [vmem:[%s1010_s12] sm:$0xff]  ;;  %v1023_v5 = vsel %vm244_vm1, %v296_v1, 0.0  ;;  %v1027_v6 = vsel %vm244_vm1, %v399_v2, 0.0  ;;  %v251_v8 = vld [vmem:[%s1010_s12 + $0x30] sm:$0xff]  ;;  %v255_v10 = vsel %vm253_vm0, %v247_v4, 0.0  ;;  %v271_v13 = vld [vmem:[%s210_s21 + $0x18] sm:$0xff]  ;;  %v327_v1 = vlaneseq }
  0x5b   : > { %v249_v7 = vld [vmem:[%s1010_s12 + $0x20] sm:$0xff]  ;;  %v254_v9 = vsel %vm253_vm0, %v245_v3, 0.0  ;;  %304 = vrot.lane.b32.xlu1 %v1023_v5, %s828_s20  ;;  %407 = vrot.lane.b32.xlu0 %v1027_v6, %s828_s20  ;;  %v259_v15 = vsel %vm253_vm0, %v251_v8, 0.0  ;;  %v273_v16 = vld [vmem:[%s210_s21 + $0x28] sm:$0xff]  ;;  %v283_v18 = vsel %vm253_vm0, %v269_v12, 0.0  ;;  %v284_v20 = vsel %vm253_vm0, %v271_v13, 0.0 }
  0x5c   : > { %v257_v11 = vsel %vm253_vm0, %v249_v7, 0.0  ;;  %v256_v14 = vadd.f32 %v255_v10, %v254_v9  ;;  %v275_v17 = vld [vmem:[%s210_s21 + $0x38] sm:$0xff]  ;;  %v246_v19 = vld [vmem:[%s1010_s12 + $0x8] sm:$0xff]  ;;  %v286_v21 = vsel %vm253_vm0, %v273_v16, 0.0  ;;  %v285_v27 = vadd.f32 %v284_v20, %v283_v18  ;;  %v268_v30 = vld [vmem:[%s210_s21] sm:$0xff]  ;;  %s1231_s6 = smov (!%p236_p0, %s941_s6), 1 }
  0x5d   : > { %v288_v22 = vsel %vm253_vm0, %v275_v17, 0.0  ;;  %v248_v23 = vld [vmem:[%s1010_s12 + $0x18] sm:$0xff]  ;;  %v250_v24 = vld [vmem:[%s1010_s12 + $0x28] sm:$0xff]  ;;  %v261_v28 = vsel %vm253_vm0, %v246_v19, 0.0  ;;  %v270_v31 = vld [vmem:[%s210_s21 + $0x10] sm:$0xff]  ;;  %v276_v37 = vsel %vm253_vm0, %v268_v30, 0.0  ;;  %v317_v62 = vadd.f32 %v1023_v5, %v1023_v5  ;;  %s238_s15 = scalar_lea.vmem %s1215_s3, %s1231_s6 }
  0x5e   : > { %v252_v25 = vld [vmem:[%s1010_s12 + $0x38] sm:$0xff]  ;;  %v258_v26 = vadd.f32 %v257_v11, %v256_v14  ;;  %v262_v29 = vsel %vm253_vm0, %v248_v23, 0.0  ;;  %v272_v32 = vld [vmem:[%s210_s21 + $0x20] sm:$0xff]  ;;  %v264_v34 = vsel %vm253_vm0, %v250_v24, 0.0  ;;  %v274_v36 = vld [vmem:[%s210_s21 + $0x30] sm:$0xff]  ;;  %v287_v39 = vadd.f32 %v286_v21, %v285_v27 }
  0x5f   : > { %310 = vrot.lane.b32.xlu1 %v1023_v5, %s829_s26  ;;  %v263_v33 = vadd.f32 %v262_v29, %v261_v28  ;;  %v266_v35 = vsel %vm253_vm0, %v252_v25, 0.0  ;;  %v277_v40 = vsel %vm253_vm0, %v270_v31, 0.0  ;;  %v279_v41 = vsel %vm253_vm0, %v272_v32, 0.0  ;;  %v1058_v48 = vld [vmem:[#allocation4] sm:$0xff]  ;;  %v1062_v50 = vld [vmem:[#allocation4 + $0x8] sm:$0xff] }
  0x60   : > { %v260_v38 = vadd.f32 %v259_v15, %v258_v26  ;;  %v278_v43 = vadd.f32 %v277_v40, %v276_v37  ;;  %v289_v44 = vadd.f32 %v288_v22, %v287_v39  ;;  %v281_v45 = vsel %vm253_vm0, %v274_v36, 0.0 }
  0x61   : > { %v265_v42 = vadd.f32 %v264_v34, %v263_v33  ;;  %vm242_vm2 = vcmp.ne.f32.partialorder %v1058_v48, 0.0  ;;  %vm243_vm3 = vcmp.ne.f32.partialorder %v1062_v50, 0.0  ;;  %v1091_v9 = vshrl.u32 %v327_v1, 7 }
  0x62   : > { %290 = vst.msk [vmem:[#allocation2] sm:$0xff] %vm253_vm0, %v260_v38  ;;  %v280_v47 = vadd.f32 %v279_v41, %v278_v43  ;;  %293 = vst.msk [vmem:[#allocation3 + $0x8] sm:$0xff] %vm253_vm0, %v289_v44  ;;  %v420_v27 = vadd.f32 %v1027_v6, %v1027_v6 }
  0x63   : > { %v267_v46 = vadd.f32 %v266_v35, %v265_v42  ;;  %vm329_vm4 = vcmp.lt.s32.totalorder %v1091_v9, 1  ;;  %vm336_vm5 = vcmp.lt.s32.totalorder %v1091_v9, 7 }
  0x64   : > { %v282_v49 = vadd.f32 %v281_v45, %v280_v47 }
  0x65   : > { %291 = vst.msk [vmem:[#allocation2 + $0x8] sm:$0xff] %vm253_vm0, %v267_v46 }
  0x66   : > { %292 = vst.msk [vmem:[#allocation3] sm:$0xff] %vm253_vm0, %v282_v49 }
  0x69   : > { %v294_v51 = vld [vmem:[#allocation2] sm:$0xff] }
  0x6a   : > { %v297_v52 = vsel %vm242_vm2, %v294_v51, 0.0  ;;  %v398_v53 = vld [vmem:[#allocation3 + $0x8] sm:$0xff] }
  0x6b   : > { %306 = vrot.lane.b32.xlu1 %v297_v52, %s829_s26  ;;  %300 = vrot.lane.b32.xlu0 %v297_v52, %s828_s20  ;;  %v1073_v54 = vsel %vm243_vm3, %v398_v53, 0.0  ;;  %v315_v2 = vadd.f32 %v297_v52, %v297_v52 }
  0x6c   : > { %v295_v55 = vld [vmem:[#allocation2 + $0x8] sm:$0xff] }
  0x6d   : > { %v298_v56 = vsel %vm243_vm3, %v295_v55, 0.0  ;;  %v397_v57 = vld [vmem:[#allocation3] sm:$0xff] }
  0x6e   : > { %v400_v58 = vsel %vm242_vm2, %v397_v57, 0.0  ;;  %v316_v5 = vadd.f32 %v298_v56, %v298_v56 }
  0x6f   : > { %405 = vrot.lane.b32.xlu1 %v1073_v54, %s828_s20  ;;  %302 = vrot.lane.b32.xlu0 %v298_v56, %s828_s20  ;;  %v418_v28 = vadd.f32 %v400_v58, %v400_v58 }
  0x73   : > { %409 = vrot.lane.b32.xlu1 %v400_v58, %s829_s26  ;;  %308 = vrot.lane.b32.xlu0 %v298_v56, %s829_s26 }
  0x77   : > { %413 = vrot.lane.b32.xlu1 %v1027_v6, %s829_s26  ;;  %403 = vrot.lane.b32.xlu0 %v400_v58, %s828_s20 }
  0x7b   : > { %411 = vrot.lane.b32.xlu0 %v1073_v54, %s829_s26 }
  0xcd   : > { %v305_v59 = vpop.permute.xlu1 %304  ;;  %v408_v60 = vpop.permute.xlu0 %407 }
  0xd1   : > { %v311_v61 = vpop.permute.xlu1 %310 }
  0xd2   : > { %v314_v63 = vadd.f32 %v311_v61, %v305_v59  ;;  %v323_v18 = vsub.f32 %v311_v61, %v305_v59 }
  0xd4   : > { %v320_v7 = vadd.f32 %v317_v62, %v314_v63  ;;  %v326_v29 = vrot.slane %v323_v18, 7  ;;  %v335_v30 = vrot.slane %v323_v18, 1  ;;  %v345_v31 = vadd.f32 %v323_v18, %v323_v18 }
  0xd6   : > { %v351_v14 = vrot.slane %v320_v7, 7  ;;  %v357_v15 = vrot.slane %v320_v7, 1 }
  0xdd   : > { %v307_v3 = vpop.permute.xlu1 %306  ;;  %v301_v4 = vpop.permute.xlu0 %300 }
  0xde   : > { %v312_v8 = vadd.f32 %v307_v3, %v301_v4  ;;  %v321_v11 = vsub.f32 %v307_v3, %v301_v4  ;;  %v419_v4 = vadd.f32 %v1073_v54, %v1073_v54 }
  0xe0   : > { %v318_v10 = vadd.f32 %v315_v2, %v312_v8  ;;  %v324_v21 = vrot.slane %v321_v11, 7  ;;  %v333_v22 = vrot.slane %v321_v11, 1  ;;  %v343_v37 = vadd.f32 %v321_v11, %v321_v11 }
  0xe1   : > { %v1093_v12 = vpop.permute.xlu1 %405  ;;  %v303_v13 = vpop.permute.xlu0 %302 }
  0xe2   : > { %v349_v16 = vrot.slane %v318_v10, 7  ;;  %v355_v17 = vrot.slane %v318_v10, 1  ;;  %v332_v35 = vsel %vm329_vm4, %v326_v29, %v324_v21  ;;  %v339_v36 = vsel %vm336_vm5, %v335_v30, %v333_v22 }
  0xe4   : > { %v354_v19 = vsel %vm329_vm4, %v351_v14, %v349_v16  ;;  %v360_v20 = vsel %vm336_vm5, %v357_v15, %v355_v17 }
  0xe5   : > { %v410_v23 = vpop.permute.xlu1 %409  ;;  %v309_v24 = vpop.permute.xlu0 %308 }
  0xe6   : > { %v313_v25 = vadd.f32 %v309_v24, %v303_v13  ;;  %v322_v26 = vsub.f32 %v309_v24, %v303_v13 }
  0xe8   : > { %v319_v32 = vadd.f32 %v316_v5, %v313_v25  ;;  %v325_v33 = vrot.slane %v322_v26, 7  ;;  %v334_v34 = vrot.slane %v322_v26, 1  ;;  %v344_v38 = vadd.f32 %v322_v26, %v322_v26 }
  0xe9   : > { %v414_v39 = vpop.permute.xlu1 %413  ;;  %v404_v40 = vpop.permute.xlu0 %403 }
  0xea   : > { %v330_v6 = vsel %vm329_vm4, %v325_v33, %v326_v29  ;;  %v331_v41 = vsel %vm329_vm4, %v324_v21, %v325_v33  ;;  %v337_v42 = vsel %vm336_vm5, %v334_v34, %v335_v30  ;;  %v338_v43 = vsel %vm336_vm5, %v333_v22, %v334_v34 }
  0xeb   : > { %v340_v44 = vadd.f32 %v338_v43, %v332_v35  ;;  %v341_v45 = vadd.f32 %v337_v42, %v331_v41  ;;  %v342_v46 = vadd.f32 %v339_v36, %v330_v6  ;;  %v350_v47 = vrot.slane %v319_v32, 7 }
  0xec   : > { %v356_v49 = vrot.slane %v319_v32, 1  ;;  %v417_v51 = vadd.f32 %v414_v39, %v408_v60  ;;  %v426_v52 = vsub.f32 %v414_v39, %v408_v60  ;;  %v415_v53 = vadd.f32 %v410_v23, %v404_v40 }
  0xed   : > { %v346_v55 = vadd.f32 %v343_v37, %v340_v44  ;;  %v347_v56 = vadd.f32 %v344_v38, %v341_v45  ;;  %v348_v57 = vadd.f32 %v345_v31, %v342_v46  ;;  %v352_v58 = vsel %vm329_vm4, %v350_v47, %v351_v14  ;;  %v412_v11 = vpop.permute.xlu0 %411 }
  0xee   : > { %v353_v59 = vsel %vm329_vm4, %v349_v16, %v350_v47  ;;  %v358_v61 = vsel %vm336_vm5, %v356_v49, %v357_v15  ;;  %v359_v62 = vsel %vm336_vm5, %v355_v17, %v356_v49  ;;  %v363_v63 = vsub.f32 %v352_v58, %v360_v20 }
  0xef   : > { %v361_v1 = vsub.f32 %v354_v19, %v359_v62  ;;  %v362_v2 = vsub.f32 %v353_v59, %v358_v61  ;;  %v364_v60 = vand.u32 2147483647, %v346_v55  ;;  %v365_v3 = vand.u32 2147483647, %v347_v56 }
  0xf0   : > { %v366_v7 = vand.u32 2147483647, %v348_v57  ;;  %v369_v8 = vand.u32 2147483647, %v363_v63  ;;  %v423_v10 = vadd.f32 %v420_v27, %v417_v51  ;;  %v429_v16 = vrot.slane %v426_v52, 7 }
  0xf1   : > { %v367_v13 = vand.u32 2147483647, %v361_v1  ;;  %v368_v14 = vand.u32 2147483647, %v362_v2  ;;  %v435_v18 = vrot.slane %v426_v52, 1  ;;  %v421_v17 = vadd.f32 %v418_v28, %v415_v53 }
  0xf2   : > { %v372_v15 = vadd.f32 %v369_v8, %v366_v7  ;;  %v450_v5 = vrot.slane %v423_v10, 7  ;;  %v456_v21 = vrot.slane %v423_v10, 1  ;;  %v424_v22 = vsub.f32 %v410_v23, %v404_v40 }
  0xf3   : > { %v370_v20 = vadd.f32 %v367_v13, %v364_v60  ;;  %v371_v19 = vadd.f32 %v368_v14, %v365_v3  ;;  %v416_v24 = vadd.f32 %v412_v11, %v1093_v12  ;;  %v444_v25 = vadd.f32 %v426_v52, %v426_v52 }
  0xf4   : > { %v448_v26 = vrot.slane %v421_v17, 7  ;;  %v454_v54 = vrot.slane %v421_v17, 1  ;;  %v425_v29 = vsub.f32 %v412_v11, %v1093_v12  ;;  %v1129_v30 = vadd.f32 1e-10, %v372_v15 }
  0xf5   : > { %v1127_v27 = vadd.f32 1e-10, %v370_v20  ;;  %v427_v31 = vrot.slane %v424_v22, 7  ;;  %v433_v32 = vrot.slane %v424_v22, 1  ;;  %v1131_v33 = vadd.f32 1e-10, %v371_v19 }
  0xf6   : > { %v453_v28 = vsel %vm329_vm4, %v450_v5, %v448_v26  ;;  %v459_v23 = vsel %vm336_vm5, %v456_v21, %v454_v54  ;;  %v422_v34 = vadd.f32 %v419_v4, %v416_v24  ;;  %v442_v36 = vadd.f32 %v424_v22, %v424_v22 }
  0xf7   : > { %v432_v35 = vsel %vm329_vm4, %v429_v16, %v427_v31  ;;  %v428_v12 = vrot.slane %v425_v29, 7  ;;  %v434_v37 = vrot.slane %v425_v29, 1  ;;  %v438_v38 = vsel %vm336_vm5, %v435_v18, %v433_v32 }
  0xf8   : > { %v443_v39 = vadd.f32 %v425_v29, %v425_v29  ;;  %v449_v40 = vrot.slane %v422_v34, 7  ;;  %v455_v6 = vrot.slane %v422_v34, 1  ;;  %689 = vrsqrt.f32 %v1127_v27 }
  0xf9   : > { %v430_v41 = vsel %vm329_vm4, %v428_v12, %v429_v16  ;;  %v431_v42 = vsel %vm329_vm4, %v427_v31, %v428_v12  ;;  %v436_v43 = vsel %vm336_vm5, %v434_v37, %v435_v18  ;;  %v437_v44 = vsel %vm336_vm5, %v433_v32, %v434_v37 }
  0xfa   : > { %v439_v45 = vadd.f32 %v437_v44, %v432_v35  ;;  %v440_v46 = vadd.f32 %v436_v43, %v431_v42  ;;  %v441_v47 = vadd.f32 %v438_v38, %v430_v41  ;;  %v451_v49 = vsel %vm329_vm4, %v449_v40, %v450_v5 }
  0xfb   : > { %v452_v51 = vsel %vm329_vm4, %v448_v26, %v449_v40  ;;  %v457_v52 = vsel %vm336_vm5, %v455_v6, %v456_v21  ;;  %v458_v53 = vsel %vm336_vm5, %v454_v54, %v455_v6  ;;  %v462_v55 = vsub.f32 %v451_v49, %v459_v23 }
  0xfc   : > { %v445_v56 = vadd.f32 %v442_v36, %v439_v45  ;;  %v446_v57 = vadd.f32 %v443_v39, %v440_v46  ;;  %v447_v58 = vadd.f32 %v444_v25, %v441_v47  ;;  %v460_v59 = vsub.f32 %v453_v28, %v458_v53 }
  0xfd   : > { %v461_v61 = vsub.f32 %v452_v51, %v457_v52  ;;  %v468_v62 = vand.u32 2147483647, %v462_v55  ;;  %691 = vrsqrt.f32 %v1131_v33  ;;  %vm378_vm6 = vcmp.eq.f32.partialorder %v1127_v27, inf }
  0xfe   : > { %v463_v63 = vand.u32 2147483647, %v445_v56  ;;  %v464_v1 = vand.u32 2147483647, %v446_v57  ;;  %v465_v2 = vand.u32 2147483647, %v447_v58  ;;  %693 = vrsqrt.f32 %v1129_v30 }
  0xff   : > { %v466_v60 = vand.u32 2147483647, %v460_v59  ;;  %v467_v3 = vand.u32 2147483647, %v461_v61  ;;  %vm380_vm7 = vcmp.eq.f32.partialorder %v1127_v27, 0.0  ;;  %v381_v5 = vand.u32 2147483648, %v1127_v27 }
 0x100   : > { %v471_v4 = vadd.f32 %v468_v62, %v465_v2  ;;  %vm385_vm8 = vcmp.eq.f32.partialorder %v1131_v33, inf  ;;  %vm387_vm9 = vcmp.eq.f32.partialorder %v1131_v33, 0.0  ;;  %v388_v17 = vand.u32 2147483648, %v1131_v33 }
 0x101   : > { %v469_v9 = vadd.f32 %v466_v60, %v463_v63  ;;  %v470_v7 = vadd.f32 %v467_v3, %v464_v1  ;;  %vm392_vm10 = vcmp.eq.f32.partialorder %v1129_v30, inf  ;;  %vm394_vm11 = vcmp.eq.f32.partialorder %v1129_v30, 0.0 }
 0x102   : > { %v474_v8 = vadd.f32 1e-10, %v471_v4  ;;  %v395_v19 = vand.u32 2147483648, %v1129_v30 }
 0x103   : > { %v472_v10 = vadd.f32 1e-10, %v469_v9  ;;  %v473_v11 = vadd.f32 1e-10, %v470_v7 }
 0x104   : > { %695 = vrsqrt.f32 %v474_v8  ;;  %vm491_vm12 = vcmp.eq.f32.partialorder %v474_v8, inf  ;;  %vm493_vm13 = vcmp.eq.f32.partialorder %v474_v8, 0.0  ;;  %v494_v22 = vand.u32 2147483648, %v474_v8 }
 0x105   : > { %697 = vrsqrt.f32 %v472_v10  ;;  %v690_v13 = vpop.eup %689  ;;  %vm477_vm14 = vcmp.eq.f32.partialorder %v472_v10, inf  ;;  %vm479_vm15 = vcmp.eq.f32.partialorder %v472_v10, 0.0  ;;  %v480_v32 = vand.u32 2147483648, %v472_v10 }
 0x106   : > { %699 = vrsqrt.f32 %v473_v11  ;;  %v377_v15 = vmul.f32 %v690_v13, %v1127_v27  ;;  %vm484_vm0 = vcmp.eq.f32.partialorder %v473_v11, inf  ;;  %vm486_vm4 = vcmp.eq.f32.partialorder %v473_v11, 0.0 }
 0x107   : > { %v487_v36 = vand.u32 2147483648, %v473_v11 }
 0x108   : > { %v379_v29 = vsel %vm378_vm6, %v1127_v27, %v377_v15 }
 0x109   : > { %v382_v38 = vsel %vm380_vm7, %v381_v5, %v379_v29 }
 0x10a   : > { %v692_v14 = vpop.eup %691 }
 0x10b   : > { %v694_v16 = vpop.eup %693  ;;  %v384_v21 = vmul.f32 %v692_v14, %v1131_v33 }
 0x10c   : > { %v391_v18 = vmul.f32 %v694_v16, %v1129_v30 }
 0x10d   : > { %v386_v28 = vsel %vm385_vm8, %v1131_v33, %v384_v21 }
 0x10e   : > { %v393_v25 = vsel %vm392_vm10, %v1129_v30, %v391_v18  ;;  %v389_v42 = vsel %vm387_vm9, %v388_v17, %v386_v28 }
 0x10f   : > { %v396_v12 = vsel %vm394_vm11, %v395_v19, %v393_v25 }
 0x111   : > { %v696_v20 = vpop.eup %695 }
 0x112   : > { %v698_v24 = vpop.eup %697  ;;  %v490_v26 = vmul.f32 %v696_v20, %v474_v8 }
 0x113   : > { %v700_v54 = vpop.eup %699  ;;  %v476_v31 = vmul.f32 %v698_v24, %v472_v10 }
 0x114   : > { %v483_v23 = vmul.f32 %v700_v54, %v473_v11  ;;  %v492_v34 = vsel %vm491_vm12, %v474_v8, %v490_v26 }
 0x115   : > { %v478_v35 = vsel %vm477_vm14, %v472_v10, %v476_v31  ;;  %v495_v37 = vsel %vm493_vm13, %v494_v22, %v492_v34 }
 0x116   : > { %v481_v39 = vsel %vm479_vm15, %v480_v32, %v478_v35  ;;  %v485_v40 = vsel %vm484_vm0, %v473_v11, %v483_v23  ;;  %v498_v6 = vsub.f32 %v396_v12, %v495_v37 }
 0x117   : > { %v496_v41 = vsub.f32 %v382_v38, %v481_v39  ;;  %v488_v43 = vsel %vm486_vm4, %v487_v36, %v485_v40 }
 0x118   : > { %v497_v44 = vsub.f32 %v389_v42, %v488_v43  ;;  %v501_v47 = vand.u32 2147483647, %v498_v6 }
 0x119   : > { %v499_v45 = vand.u32 2147483647, %v496_v41 }
 0x11a   : > { %v500_v46 = vand.u32 2147483647, %v497_v44  ;;  %v504_v49 = vsel %vm244_vm1, %v501_v47, 0.0 }
 0x11b   : > { %v502_v30 = vsel %vm242_vm2, %v499_v45, 0.0  ;;  %vm519_vm2 = vcmask 0  }
 0x11c   : > { %505 = vadd.xlane.f32.xlu0 %v502_v30  ;;  %v503_v27 = vsel %vm243_vm3, %v500_v46, 0.0 }
 0x11d   : > { %507 = vadd.xlane.f32.xlu1 %v503_v27 }
 0x120   : > { %509 = vadd.xlane.f32.xlu0 %v504_v49 }
 0x1a5   : > { %v506_v33 = vpop.xlane.xlu0 %505 }
 0x1a6   : > { %v508_v51 = vpop.xlane.xlu1 %507 }
 0x1a7   : > { %v511_v52 = vadd.f32 %v508_v51, %v506_v33 }
 0x1a9   : > { %v510_v53 = vpop.xlane.xlu0 %509 }
 0x1aa   : > { %v512_v55 = vadd.f32 %v511_v52, %v510_v53 }
 0x1ac   : > { %v513_v56 = vrot.slane %v512_v55, 4 }
 0x1ae   : > { %v514_v48 = vadd.f32 %v513_v56, %v512_v55 }
 0x1b0   : > { %v515_v57 = vrot.slane %v514_v48, 2 }
 0x1b2   : > { %v516_v58 = vadd.f32 %v515_v57, %v514_v48 }
 0x1b4   : > { %v517_v59 = vrot.slane %v516_v58, 1 }
 0x1b6   : > { %v518_v0 = vadd.f32 %v517_v59, %v516_v58 }
 0x1b8   : > { %520 = vst.msk [vmem:[%s238_s15] sm:$0x1] %vm519_vm2, %v518_v0 }
 0x1b9 PF: > { %p14_p4 = scmp.ge.s32.totalorder %s871_s16, 4   ;;  %s1226_s12 = smov %s813_s13 }
 0x1ba   : > { %s1227_s13 = smov %s817_s14  ;;  %s1228_s14 = smov %s880_s19 }
 0x1bb   : > { %s1229_s15 = smov %s871_s16  ;;  %16 = sbr.rel (!%p14_p4) target bundleno = 4 (0x4), region = 88 }
 0x1c0   :  { %538 = vsyncpa [#allocation5], 1 }
 0x1c1   :  { %540 = vsyncpa [#allocation5 + $0x1], 1 }
 0x1c2   :  { %541 = vsyncpa [#allocation7], 1 }
 0x1c3   :  { %543 = vsyncpa [#allocation7 + $0x1], 1 }

</bundles_post_ra>
